<compile_context>
chip_gen: v7x
topology: tpu7x:2x2x1
jax: 0.10.0
libtpu: 0.0.40
codegen_flags: <defaults>
</compile_context>

<pallas_src>
import jax
import jax.numpy as jnp
from jax.experimental import pallas as pl
from jax.experimental.pallas import tpu as pltpu

LANES = 128


def attention_model_kernel(
    x_ref,        # (B, input_dim)
    w1_ref,       # (input_dim, hidden_dim)
    b1_ref,       # (1, hidden_dim)
    w2p_ref,      # (hidden_dim, padded_out)   lane-dense (multiple of 128)
    b2p_ref,      # (1, padded_out)
    out_ref,      # (B, padded_out)
):
    x = x_ref[...]

    # fc1
    h = jnp.dot(x, w1_ref[...], preferred_element_type=jnp.float32) + b1_ref[...]

    # Attention over a length-1 sequence has weights identically equal to 1.0,
    # so the weighted sum over the seq dim is exactly h.  fc2 directly:
    out_ref[...] = (
        jnp.dot(h, w2p_ref[...], preferred_element_type=jnp.float32) + b2p_ref[...]
    )


def attention_model_forward(x, params):
    """x: (B, input_dim) float32. Returns (out (B, output_dim), attn (B, 1, 1))."""
    B = x.shape[0]
    w1, b1, wa1, ba1, wa2, ba2, w2, b2 = params  # attention params unused (attn == 1)
    output_dim = w2.shape[1]

    # Pad the output lane dimension to a multiple of 128 so the kernel's store
    # is unmasked / lane-dense; slice back afterwards.
    padded_out = max(LANES, ((output_dim + LANES - 1) // LANES) * LANES)
    pad = padded_out - output_dim
    w2p = jnp.pad(w2, ((0, 0), (0, pad)))
    b2p = jnp.pad(b2, ((0, 0), (0, pad)))

    vmem = pl.BlockSpec(memory_space=pltpu.MemorySpace.VMEM)
    out_padded = pl.pallas_call(
        attention_model_kernel,
        out_shape=jax.ShapeDtypeStruct((B, padded_out), jnp.float32),
        in_specs=[vmem] * 5,
        out_specs=vmem,
    )(x, w1, b1, w2p, b2p)

    out = out_padded[:, :output_dim]

    # softmax over a size-1 axis is exactly 1.0 for all finite scores.
    # TODO(synk): if the attention MLP produced NaN/Inf, PyTorch would propagate
    # it into attention_weights/out; this fast path does not.
    attn = jnp.ones((B, 1, 1), jnp.float32)
    return out, attn


def init_params(key, input_dim, attention_dim, hidden_dim, output_dim):
    """Deterministic parameter init. Weights stored as (in, out)."""
    ks = jax.random.split(key, 8)
    scale = 0.1
    w1 = scale * jax.random.normal(ks[0], (input_dim, hidden_dim), jnp.float32)
    b1 = scale * jax.random.normal(ks[1], (1, hidden_dim), jnp.float32)
    wa1 = scale * jax.random.normal(ks[2], (hidden_dim, attention_dim), jnp.float32)
    ba1 = scale * jax.random.normal(ks[3], (1, attention_dim), jnp.float32)
    wa2 = scale * jax.random.normal(ks[4], (attention_dim, 1), jnp.float32)
    ba2 = scale * jax.random.normal(ks[5], (1, 1), jnp.float32)
    w2 = scale * jax.random.normal(ks[6], (hidden_dim, output_dim), jnp.float32)
    b2 = scale * jax.random.normal(ks[7], (1, output_dim), jnp.float32)
    return (w1, b1, wa1, ba1, wa2, ba2, w2, b2)


def reference_forward(x, params):
    """Pure-JAX reference mirroring the PyTorch forward exactly."""
    w1, b1, wa1, ba1, wa2, ba2, w2, b2 = params
    h = x @ w1 + b1                                   # fc1, (B, H)
    hu = h[:, None, :]                                # unsqueeze(1) -> (B, 1, H)
    s = jnp.maximum(hu @ wa1 + ba1, 0.0) @ wa2 + ba2  # (B, 1, 1)
    attn = jax.nn.softmax(s, axis=1)                  # softmax over seq dim (size 1)
    ws = jnp.sum(hu * attn, axis=1)                   # (B, H)
    out = ws @ w2 + b2                                # (B, output_dim)
    return out, attn


if __name__ == "__main__":
    batch = 8
    input_dim = 32
    attention_dim = 16
    hidden_dim = 32
    output_dim = 8

    key = jax.random.PRNGKey(0)
    k_x, k_p = jax.random.split(key)
    # Input shaped like a flattenable tensor; forward does x.view(B, -1).
    x_raw = jax.random.normal(k_x, (batch, 4, 8), jnp.float32)  # 4*8 == input_dim
    x = x_raw.reshape(batch, -1)

    params = init_params(k_p, input_dim, attention_dim, hidden_dim, output_dim)

    out, attn = attention_model_forward(x, params)
    out, attn = jax.block_until_ready((out, attn))

    ref_out, ref_attn = reference_forward(x, params)
    assert out.shape == (batch, output_dim)
    assert attn.shape == (batch, 1, 1)
    assert jnp.allclose(out, ref_out, atol=1e-5, rtol=1e-5)
    assert jnp.allclose(attn, ref_attn, atol=1e-6, rtol=1e-6)

    print("KERNEL_OK")
</pallas_src>

<mosaic_0001>
module attributes {stable_mosaic.version = 11 : i64} {
  func.func @attention_model_kernel(%arg0: memref<8x32xf32, #tpu.memory_space<vmem>>, %arg1: memref<32x32xf32, #tpu.memory_space<vmem>>, %arg2: memref<1x32xf32, #tpu.memory_space<vmem>>, %arg3: memref<32x128xf32, #tpu.memory_space<vmem>>, %arg4: memref<1x128xf32, #tpu.memory_space<vmem>>, %arg5: memref<8x128xf32, #tpu.memory_space<vmem>>) attributes {dimension_semantics = [], scalar_prefetch = 0 : i64, scratch_operands = 0 : i64, tpu.core_type = #tpu.core_type<tc>} {
    %c0 = arith.constant 0 : index
    %c0_0 = arith.constant 0 : index
    %0 = vector.load %arg0[%c0, %c0_0] : memref<8x32xf32, #tpu.memory_space<vmem>>, vector<8x32xf32>
    %c0_1 = arith.constant 0 : index
    %c0_2 = arith.constant 0 : index
    %1 = vector.load %arg1[%c0_1, %c0_2] : memref<32x32xf32, #tpu.memory_space<vmem>>, vector<32x32xf32>
    %cst = arith.constant dense<0.000000e+00> : vector<8x32xf32>
    %2 = tpu.matmul %0, %1, %cst {dimension_numbers = #tpu.dot_dimension_numbers<[1], [0], [0], [1], [0, 0, 1, 1], [], []>} : vector<8x32xf32>, vector<32x32xf32>, vector<8x32xf32> -> vector<8x32xf32>
    %c0_3 = arith.constant 0 : index
    %c0_4 = arith.constant 0 : index
    %3 = vector.load %arg2[%c0_3, %c0_4] : memref<1x32xf32, #tpu.memory_space<vmem>>, vector<1x32xf32>
    %4 = vector.broadcast %3 : vector<1x32xf32> to vector<8x32xf32>
    %5 = arith.addf %2, %4 : vector<8x32xf32>
    %c0_5 = arith.constant 0 : index
    %c0_6 = arith.constant 0 : index
    %6 = vector.load %arg3[%c0_5, %c0_6] : memref<32x128xf32, #tpu.memory_space<vmem>>, vector<32x128xf32>
    %cst_7 = arith.constant dense<0.000000e+00> : vector<8x128xf32>
    %7 = tpu.matmul %5, %6, %cst_7 {dimension_numbers = #tpu.dot_dimension_numbers<[1], [0], [0], [1], [0, 0, 1, 1], [], []>} : vector<8x32xf32>, vector<32x128xf32>, vector<8x128xf32> -> vector<8x128xf32>
    %c0_8 = arith.constant 0 : index
    %c0_9 = arith.constant 0 : index
    %8 = vector.load %arg4[%c0_8, %c0_9] : memref<1x128xf32, #tpu.memory_space<vmem>>, vector<1x128xf32>
    %9 = vector.broadcast %8 : vector<1x128xf32> to vector<8x128xf32>
    %10 = arith.addf %7, %9 : vector<8x128xf32>
    %c0_10 = arith.constant 0 : index
    %c0_11 = arith.constant 0 : index
    %11 = vector.load %arg5[%c0_10, %c0_11] : memref<8x128xf32, #tpu.memory_space<vmem>>, vector<8x128xf32>
    tpu.vector_store %arg5[%c0_10, %c0_11], %10 {strides = array<i32>} : memref<8x128xf32, #tpu.memory_space<vmem>>, vector<8x128xf32>,
    return
  }
}

</mosaic_0001>

<bundles_post_ra>
// kernel: tpu_custom_call.1
= control target key start
LH: loop header
LB: loop body
LE: loop exit
PB: predicated region body
PF: predicated region fallthrough
CT: control target
= control target key end

     0   :  { %10 = vsyncpa [#allocation3], 0  ;;  %s497_s0 = inlined_call_operand.hbm [shape: f32[8,32], index: 0, kind: input, shape index: {}]   ;;  %s498_s1 = inlined_call_operand.hbm [shape: f32[32,32], index: 1, kind: input, shape index: {}]   ;;  %s499_s2 = inlined_call_operand.vmem [shape: f32[1,32], index: 2, kind: input, shape index: {}]   ;;  %s500_s3 = inlined_call_operand.hbm [shape: f32[32,128], index: 3, kind: input, shape index: {}]   ;;  %s501_s4 = inlined_call_operand.vmem [shape: f32[1,128], index: 4, kind: input, shape index: {}]   ;;  %s502_s5 = inlined_call_operand.hbm [shape: f32[8,128], index: 5, kind: output, shape index: {}]  }
   0x1   :  { %11 = vsyncpa [#allocation6], 0 }
   0x2   :  { %12 = vsyncpa [#allocation4], 0  ;;  %s398_s18 = smov [#allocation5]   ;;  %s304_s22 = scalar_lea.hbm %s498_s1, 512 }
   0x3   :  { %s28_s19 = sshll.u32 %s398_s18, 4  ;;  %p305_p0 = scmp.ne.s32.totalorder %s498_s1, %s304_s22  ;;  %s29_s19 = int_to_ptr.vmem [resolvable:$true] %s28_s19 }
   0x4   :  { %p308_p1 = scmp.lt.u32.totalorder %s304_s22, %s498_s1 }
   0x6   :  { %p310_p2 = pnand %p308_p1, %p305_p0 }
   0x8   :  { %313 = shalt.err (!%p310_p2)
}
   0x9   :  { %s314_s27 = scalar_lea.vmem %s29_s19, 512  ;;  %p319_p4 = scmp.lt.s32.totalorder %s29_s19, %s29_s19 }
   0xa   :  { %p315_p3 = scmp.ne.s32.totalorder %s29_s19, %s314_s27  ;;  %p320_p5 = scmp.lt.s32.totalorder %s314_s27, %s314_s27 }
   0xc   :  { %p321_p6 = por %p320_p5, %p319_p4 }
   0xe   :  { %p322_p7 = pnand %p321_p6, %p315_p3 }
  0x10   :  { %325 = shalt.err (!%p322_p7)
}
  0x11   :  { %s399_s28 = smov 128   ;;  %s400_s29 = smov 8  }
  0x12   :  { %34 = dma.hbm_to_vmem [thread:$0]  %s498_s1, 512, %s29_s19, [#allocation6], %s399_s28, %s399_s28, %s400_s29  }
  0x13   :  { %s401_s7 = smov [#allocation2]   ;;  %s402_s9 = smov [#allocation7]  }
  0x14   :  { %s19_s8 = sshll.u32 %s401_s7, 4  ;;  %s42_s10 = sshll.u32 %s402_s9, 4  ;;  %s20_s8 = int_to_ptr.vmem [resolvable:$true] %s19_s8  ;;  %s43_s10 = int_to_ptr.vmem [resolvable:$true] %s42_s10 }
  0x15   :  { %s326_s13 = scalar_lea.hbm %s497_s0, 128 }
  0x16   :  { %p327_p8 = scmp.ne.s32.totalorder %s497_s0, %s326_s13  ;;  %p330_p9 = scmp.lt.u32.totalorder %s326_s13, %s497_s0 }
  0x18   :  { %p332_p10 = pnand %p330_p9, %p327_p8 }
  0x1a   :  { %335 = shalt.err (!%p332_p10)
}
  0x1b   :  { %s336_s1 = scalar_lea.vmem %s20_s8, 128  ;;  %p341_p12 = scmp.lt.s32.totalorder %s20_s8, %s20_s8 }
  0x1c   :  { %p337_p11 = scmp.ne.s32.totalorder %s20_s8, %s336_s1  ;;  %p342_p13 = scmp.lt.s32.totalorder %s336_s1, %s336_s1 }
  0x1e   :  { %p343_p0 = por %p342_p13, %p341_p12 }
  0x20   :  { %p344_p1 = pnand %p343_p0, %p337_p11 }
  0x22   :  { %347 = shalt.err (!%p344_p1)
}
  0x23   :  { %22 = dma.hbm_to_vmem [thread:$0]  %s497_s0, 128, %s20_s8, [#allocation3]  }
  0x24   :  { %s348_s22 = scalar_lea.hbm %s500_s3, 512 }
  0x25   :  { %p349_p2 = scmp.ne.s32.totalorder %s500_s3, %s348_s22  ;;  %p352_p3 = scmp.lt.u32.totalorder %s348_s22, %s500_s3 }
  0x27   :  { %p354_p4 = pnand %p352_p3, %p349_p2 }
  0x29   :  { %357 = shalt.err (!%p354_p4)
}
  0x2a   :  { %s358_s27 = scalar_lea.vmem %s43_s10, 512  ;;  %p363_p6 = scmp.lt.s32.totalorder %s43_s10, %s43_s10 }
  0x2b   :  { %p359_p5 = scmp.ne.s32.totalorder %s43_s10, %s358_s27  ;;  %p364_p7 = scmp.lt.s32.totalorder %s358_s27, %s358_s27 }
  0x2d   :  { %p365_p8 = por %p364_p7, %p363_p6 }
  0x2f   :  { %p366_p9 = pnand %p365_p8, %p359_p5 }
  0x31   :  { %369 = shalt.err (!%p366_p9)
}
  0x32   :  { %48 = dma.hbm_to_vmem [thread:$0]  %s500_s3, 512, %s43_s10, [#allocation6], %s399_s28, %s399_s28, %s400_s29  }
  0x33   :  { %392 = dma.done.wait [#allocation3], 128  }
  0x34   :  { %393 = vsyncadd [#allocation3], 4294967168 }
  0x35   :  { %394 = dma.done.wait [#allocation6], 1024  }
  0x36   :  { %395 = vsyncadd [#allocation6], 4294966272  ;;  %v403_v0 = vmov 0.0|0.0   ;;  %vm404_vm0 = vmmov 0   ;;  %v405_v1 = vmov 0.0   ;;  %v61_v2 = vld [vmem:[#allocation5] sm:$0xff] }
  0x37   :  { %283 = vmatprep.subr.bf16.mxu0 %v403_v0  ;;  %269 = vmatprep.mubr.msk.f32.mxu0 %vm404_vm0, %v405_v1  ;;  %v62_v3 = vld [vmem:[#allocation5 + $0x8] sm:$0xff]  ;;  %v63_v4 = vld [vmem:[#allocation5 + $0x10] sm:$0xff]  ;;  %v64_v6 = vld [vmem:[#allocation5 + $0x18] sm:$0xff]  ;;  %vm72_vm1 = vcmask 261120   ;;  %s406_s7 = smov [#allocation8]  }
  0x38   :  { %289 = vmatprep.subr.bf16.mxu1 %v403_v0  ;;  %280 = vmatprep.mubr.msk.f32.mxu1 %vm404_vm0, %v405_v1  ;;  %v284_v5 = vpack.c.bf16 %v62_v3, %v61_v2  ;;  %v146_v7 = vld [vmem:[#allocation7] sm:$0xff]  ;;  %v147_v8 = vld [vmem:[#allocation7 + $0x8] sm:$0xff]  ;;  %v287_v9 = vpack.c.bf16 %v64_v6, %v63_v4  ;;  %v60_v11 = vld [vmem:[#allocation2] sm:$0xff]  ;;  %s237_s8 = sshll.u32 %s406_s7, 4  ;;  %s238_s8 = int_to_ptr.vmem [resolvable:$true] %s237_s8 }
  0x39   :  { %v290_v10 = vpack.c.bf16 %v147_v8, %v146_v7  ;;  %v148_v12 = vld [vmem:[#allocation7 + $0x10] sm:$0xff]  ;;  %v149_v13 = vld [vmem:[#allocation7 + $0x18] sm:$0xff]  ;;  %s370_s9 = scalar_lea.vmem %s238_s8, 128  ;;  %p375_p11 = scmp.lt.s32.totalorder %s238_s8, %s238_s8 }
  0x3a   :  { %285 = vmatpush3.bf16.msra.mxu0 %v284_v5  ;;  %v293_v14 = vpack.c.bf16 %v149_v13, %v148_v12  ;;  %v247_v15 = vld [vmem:[%s499_s2] ss:$0 sm:$0xff]  ;;  %p371_p10 = scmp.ne.s32.totalorder %s238_s8, %s370_s9  ;;  %p376_p12 = scmp.lt.s32.totalorder %s370_s9, %s370_s9 }
  0x3b   :  { %286 = vmatprep.subr.bf16.mxu0 %v403_v0  ;;  %291 = vmatpush3.bf16.msra.mxu1 %v290_v10  ;;  %v249_v19 = vld [vmem:[%s501_s4] ss:$0 sm:$0xff] }
  0x3c   :  { %292 = vmatprep.subr.bf16.mxu1 %v403_v0  ;;  %p377_p13 = por %p376_p12, %p375_p11 }
  0x3e   :  { %288 = vmatpush3.bf16.msra.mxu0 %v287_v9  ;;  %p378_p0 = pnand %p377_p13, %p371_p10 }
  0x3f   :  { %294 = vmatpush3.bf16.msra.mxu1 %v293_v14 }
  0x41   :  { %270 = vmatmul.mubr.msk.f32.vlgmr.msra.gmra.mrb[0].mxu0 %vm72_vm1, %v60_v11 }
 0x114   :  { %v142_v16 = vpop.f32.mrb[0].mxu0 }
 0x115   :  { %v143_v17 = vadd.f32 %v247_v15, %v142_v16  ;;  %v271_v18 = vpop.f32.mrb[1].mxu0 }
 0x117   :  { %281 = vmatmul.mubr.msk.f32.vlgmr.msra.gmra.mrb[0].mxu1 %vm72_vm1, %v143_v17 }
 0x1ea   :  { %v226_v20 = vpop.f32.mrb[0].mxu1 }
 0x1eb   :  { %v227_v21 = vadd.f32 %v249_v19, %v226_v20  ;;  %v282_v22 = vpop.f32.mrb[1].mxu1 }
 0x1ed   :  { %230 = vst [vmem:[#allocation8] sm:$0xff] %v227_v21 }
 0x1ee   :  { %381 = shalt.err (!%p378_p0)
}
 0x1ef   :  { %s382_s11 = scalar_lea.hbm %s502_s5, 128 }
 0x1f0   :  { %p383_p1 = scmp.ne.s32.totalorder %s502_s5, %s382_s11  ;;  %p386_p2 = scmp.lt.u32.totalorder %s382_s11, %s502_s5 }
 0x1f2   :  { %p388_p3 = pnand %p386_p2, %p383_p1 }
 0x1f4   :  { %391 = shalt.err (!%p388_p3)
}
 0x1f5   :  { %240 = dma.vmem_to_hbm [thread:$0]  %s238_s8, 128, %s502_s5, [#allocation4]  }
 0x1f6   :  { %396 = dma.done.wait [#allocation4], 128  }
 0x1f7   :  { %397 = vsyncadd [#allocation4], 4294967168 }
 0x1f8   :  { %244 = vsyncpa [#allocation3], 1 }
 0x1f9   :  { %245 = vsyncpa [#allocation6], 1 }
 0x1fa   :  { %246 = vsyncpa [#allocation4], 1 }

</bundles_post_ra>
